<compile_context>
chip_gen: v7x
topology: tpu7x:2x2x1
jax: 0.10.0
libtpu: 0.0.40
codegen_flags: <defaults>
</compile_context>

<pallas_src>
import functools
import math

import jax
import jax.numpy as jnp
from jax.experimental import pallas as pl
from jax.experimental.pallas import tpu as pltpu


# --------------------------------------------------------------------------------------
# Kernel: one conv layer (kernel (K,1), stride (S,1), padding ((K-1)//2, 0)) + bias
#         (+ LeakyReLU), writing the output already zero-padded for the next layer.
# --------------------------------------------------------------------------------------
def _conv_kernel(x_ref, w_ref, b_ref, o_ref, *, n_off, ho, p_next, apply_act, slope):
    # x_ref : [TR, Q, S*Ci]      bf16  phase-merged, zero-padded input rows
    # w_ref : [n_off, S*Ci, Co]  bf16  taps packed per row-offset (zero padded)
    # b_ref : [1, 1, Co]         f32
    # o_ref : [TR, Hpad_next, Co]      output (zero-padded for the next layer)
    acc = jax.lax.dot_general(
        x_ref[:, 0:ho, :], w_ref[0],
        dimension_numbers=(((2,), (0,)), ((), ())),
        preferred_element_type=jnp.float32)                  # MXU, f32 accumulate
    for o in range(1, n_off):                                # static, n_off is 2 or 3
        acc += jax.lax.dot_general(
            x_ref[:, o:o + ho, :], w_ref[o],
            dimension_numbers=(((2,), (0,)), ((), ())),
            preferred_element_type=jnp.float32)

    res = acc + b_ref[...]
    if apply_act:                                            # LeakyReLU fused, f32
        res = jnp.where(res >= 0.0, res, res * slope)
    res = res.astype(o_ref.dtype)

    tr, hpad, co = o_ref.shape
    if p_next == 0 and hpad == ho:
        o_ref[...] = res
    else:
        if p_next > 0:
            o_ref[:, :p_next, :] = jnp.zeros((tr, p_next, co), o_ref.dtype)
        o_ref[:, p_next:p_next + ho, :] = res
        tail = hpad - p_next - ho
        if tail > 0:
            o_ref[:, p_next + ho:, :] = jnp.zeros((tr, tail, co), o_ref.dtype)


# --------------------------------------------------------------------------------------
# VMEM sizing helpers
# --------------------------------------------------------------------------------------
def _vmem_limit_bytes():
    cap = 64 * 1024 * 1024                      # conservative fallback (v7x physical)
    try:
        cap = int(pltpu.get_tpu_info().vmem_capacity_bytes)
    except Exception:
        pass
    return max(32 * 1024 * 1024, min(cap * 3 // 4, 96 * 1024 * 1024))


def _vmem_bytes(shape, dtype):
    """Approximate Mosaic VMEM footprint of a block (lane pad to 128, sublane to 8/16)."""
    itemsize = jnp.dtype(dtype).itemsize
    dims = [int(d) for d in shape]
    if len(dims) < 2:
        return max(itemsize, itemsize * (dims[0] if dims else 1))
    lanes = -(-dims[-1] // 128) * 128
    pack = max(1, 4 // itemsize)
    subl = -(-dims[-2] // (8 * pack)) * (8 * pack)
    lead = 1
    for d in dims[:-2]:
        lead *= d
    return lead * subl * lanes * itemsize


def _pick_row_tile(q, lane_in, in_dtype, hpad_out, co, out_dtype, ho, w_shape,
                   vmem_limit):
    budget = int(vmem_limit * 0.7)
    w_bytes = 2 * _vmem_bytes(w_shape, jnp.bfloat16)         # assume double buffered
    tr = 8
    while tr > 1:
        blocks = (2 * _vmem_bytes((tr, q, lane_in), in_dtype)          # input tiles
                  + 2 * _vmem_bytes((tr, hpad_out, co), out_dtype)     # output tiles
                  + 2 * _vmem_bytes((tr, ho, co), jnp.float32))        # f32 acc temps
        if blocks + w_bytes + (2 << 20) <= budget:
            break
        tr //= 2
    return tr


# --------------------------------------------------------------------------------------
# One conv layer = one pallas_call
# --------------------------------------------------------------------------------------
def _conv_layer(x_m, w_stacked, bias, *, n_off, ho, p_next, hpad_next, out_dtype,
                apply_act, slope, vmem_limit):
    rp, q, lane_in = x_m.shape
    co = w_stacked.shape[-1]
    tr = _pick_row_tile(q, lane_in, x_m.dtype, hpad_next, co, out_dtype, ho,
                        w_stacked.shape, vmem_limit)

    kern = functools.partial(_conv_kernel, n_off=n_off, ho=ho, p_next=p_next,
                             apply_act=apply_act, slope=slope)

    flops = 2 * rp * ho * lane_in * co * n_off + 2 * rp * ho * co
    bytes_accessed = (x_m.size * x_m.dtype.itemsize
                      + w_stacked.size * w_stacked.dtype.itemsize
                      + bias.size * 4
                      + rp * hpad_next * co * jnp.dtype(out_dtype).itemsize)

    return pl.pallas_call(
        kern,
        out_shape=jax.ShapeDtypeStruct((rp, hpad_next, co), out_dtype),
        grid=(rp // tr,),
        in_specs=[
            pl.BlockSpec((tr, q, lane_in), lambda i: (i, 0, 0)),     # row tiles, pipelined
            pl.BlockSpec(w_stacked.shape, lambda i: (0, 0, 0)),      # weights, resident
            pl.BlockSpec((1, 1, co), lambda i: (0, 0, 0)),           # bias, resident
        ],
        out_specs=pl.BlockSpec((tr, hpad_next, co), lambda i: (i, 0, 0)),
        compiler_params=pltpu.CompilerParams(
            dimension_semantics=("parallel",),           # shard rows across TCs
            vmem_limit_bytes=vmem_limit),
        cost_estimate=pl.CostEstimate(flops=int(flops), transcendentals=0,
                                      bytes_accessed=int(bytes_accessed)),
    )(x_m, w_stacked, bias)


# --------------------------------------------------------------------------------------
# Parameters (mimic torch Conv2d default init; weight_norm is identity at init)
# --------------------------------------------------------------------------------------
def init_params(key, channels_list=(32, 128, 512, 1024, 1024), kernel_size=5, stride=3):
    params = []
    prev = 1
    for ch in channels_list:
        key, kw, kb = jax.random.split(key, 3)
        bound = 1.0 / math.sqrt(prev * kernel_size)
        w = jax.random.uniform(kw, (kernel_size, prev, ch), jnp.float32, -bound, bound)
        b = jax.random.uniform(kb, (ch,), jnp.float32, -bound, bound)
        params.append(dict(w=w, b=b, k=kernel_size, s=stride, act=True))
        prev = ch
    key, kw, kb = jax.random.split(key, 3)
    bound = 1.0 / math.sqrt(prev * 3)
    w = jax.random.uniform(kw, (3, prev, 1), jnp.float32, -bound, bound)
    b = jax.random.uniform(kb, (1,), jnp.float32, -bound, bound)
    params.append(dict(w=w, b=b, k=3, s=1, act=False))   # final conv, no activation
    return params


# --------------------------------------------------------------------------------------
# Forward pass (matches the PyTorch module)
# --------------------------------------------------------------------------------------
def period_discriminator_forward(audios, params, period, leaky_slope=0.1):
    B, T = audios.shape
    x = audios.astype(jnp.float32)
    if T % period != 0:
        n_pad = period - T % period
        x = jnp.pad(x, ((0, 0), (0, n_pad)), mode="reflect")     # torch 'reflect'
    Tp = x.shape[1]
    H, W = Tp // period, period
    R = B * W
    Rp = -(-R // 8) * 8                                          # row-pad for tiling
    rows = x.reshape(B, H, W).transpose(0, 2, 1).reshape(R, H)   # r = b*period + w
    if Rp != R:
        rows = jnp.pad(rows, ((0, Rp - R), (0, 0)))

    # static per-layer geometry
    geoms = []
    hin = H
    for layer in params:
        K, S = layer["k"], layer["s"]
        P = (K - 1) // 2
        Ho = (hin + 2 * P - K) // S + 1
        n_off = (K - 1) // S + 1                                 # ceil(K / S)
        Q = n_off - 1 + Ho
        assert S * Q >= (Ho - 1) * S + K                         # all taps in-bounds
        assert S * Q >= P + hin                                  # padded buffer holds data
        geoms.append(dict(K=K, S=S, P=P, Hin=hin, Ho=Ho, Q=Q, n_off=n_off))
        hin = Ho

    vmem_limit = _vmem_limit_bytes()

    # layer-1 input: zero-padded rows in the phase-merged layout [Rp, Q, S*Ci] (Ci = 1)
    g0 = geoms[0]
    x_m = rows[:, :, None].astype(jnp.bfloat16)
    x_m = jnp.pad(x_m, ((0, 0), (g0["P"], g0["S"] * g0["Q"] - H - g0["P"]), (0, 0)))
    x_m = x_m.reshape(Rp, g0["Q"], g0["S"] * 1)

    feature_maps = []
    ci = 1
    n_layers = len(params)
    for idx, layer in enumerate(params):
        g = geoms[idx]
        K, S, Ho, n_off = g["K"], g["S"], g["Ho"], g["n_off"]
        w, b = layer["w"], layer["b"]
        Co = w.shape[2]

        # pack the K taps into n_off = ceil(K/S) weight slabs of shape [S*Ci, Co]
        w_stacked = jnp.pad(w, ((0, n_off * S - K), (0, 0), (0, 0)))
        w_stacked = w_stacked.reshape(n_off, S * ci, Co).astype(jnp.bfloat16)
        bias = b.astype(jnp.float32).reshape(1, 1, Co)

        if idx + 1 < n_layers:
            gn = geoms[idx + 1]
            p_next, hpad_next = gn["P"], gn["S"] * gn["Q"]       # pre-pad for next layer
            out_dtype = jnp.bfloat16
        else:
            p_next, hpad_next = 0, Ho
            out_dtype = jnp.float32
        assert p_next + Ho <= hpad_next

        out = _conv_layer(x_m, w_stacked, bias, n_off=n_off, ho=Ho, p_next=p_next,
                          hpad_next=hpad_next, out_dtype=out_dtype,
                          apply_act=layer["act"], slope=leaky_slope,
                          vmem_limit=vmem_limit)                 # [Rp, hpad_next, Co]

        fm = out[:R, p_next:p_next + Ho, :].astype(jnp.float32)  # strip pads / extra rows
        fm = fm.reshape(B, W, Ho, Co).transpose(0, 3, 2, 1)      # NCHW feature map
        feature_maps.append(fm)

        if idx + 1 < n_layers:
            gn = geoms[idx + 1]
            x_m = out.reshape(Rp, gn["Q"], gn["S"] * Co)         # free row-major reshape
            ci = Co

    flat = feature_maps[-1].reshape(B, -1)                       # == torch flatten(dim=1)
    return flat, feature_maps


# --------------------------------------------------------------------------------------
# Pure-XLA reference (precision-matched: bf16 inputs/weights, f32 accumulate)
# --------------------------------------------------------------------------------------
def reference_forward(audios, params, period, leaky_slope=0.1):
    B, T = audios.shape
    x = audios.astype(jnp.float32)
    if T % period != 0:
        x = jnp.pad(x, ((0, 0), (0, period - T % period)), mode="reflect")
    H, W = x.shape[1] // period, period
    x = x.reshape(B, 1, H, W)
    fmaps = []
    for layer in params:
        K, S = layer["k"], layer["s"]
        P = (K - 1) // 2
        w = layer["w"].astype(jnp.bfloat16)
        wk = jnp.transpose(w, (2, 1, 0))[..., None]              # [Co, Ci, K, 1]
        y = jax.lax.conv_general_dilated(
            x.astype(jnp.bfloat16), wk,
            window_strides=(S, 1), padding=((P, P), (0, 0)),
            dimension_numbers=("NCHW", "OIHW", "NCHW"),
            preferred_element_type=jnp.float32)
        y = y + layer["b"][None, :, None, None]
        if layer["act"]:
            y = jnp.where(y >= 0.0, y, y * leaky_slope)
        fmaps.append(y)
        x = y
    return x.reshape(B, -1), fmaps


if __name__ == "__main__":
    B, T, period = 2, 94, 5                    # T % period != 0 -> exercises reflect pad
    key = jax.random.PRNGKey(0)
    k_audio, k_param = jax.random.split(key)
    audios = jax.random.normal(k_audio, (B, T), jnp.float32)
    params = init_params(k_param)

    flat, fmaps = period_discriminator_forward(audios, params, period)
    flat = jax.block_until_ready(flat)
    fmaps = [jax.block_until_ready(f) for f in fmaps]

    ref_flat, ref_fmaps = reference_forward(audios, params, period)

    def max_rel_err(got, ref):
        got = jnp.asarray(got, jnp.float32)
        ref = jnp.asarray(ref, jnp.float32)
        return float(jnp.max(jnp.abs(got - ref)) / (jnp.max(jnp.abs(ref)) + 1e-6))

    assert flat.shape == (B, ref_flat.shape[1])
    assert len(fmaps) == len(ref_fmaps) == len(params)
    assert fmaps[0].shape[1] == 32 and fmaps[-1].shape[1] == 1
    assert fmaps[0].shape[3] == period
    for got, ref in zip(fmaps, ref_fmaps):
        assert got.shape == ref.shape, (got.shape, ref.shape)
        err = max_rel_err(got, ref)
        assert err < 5e-2, (got.shape, err)
    assert max_rel_err(flat, ref_flat) < 5e-2
    assert bool(jnp.all(jnp.isfinite(flat)))
    print("KERNEL_OK")
</pallas_src>

<mosaic_0001>
module attributes {stable_mosaic.version = 11 : i64} {
  func.func @_conv_kernel(%arg0: i32, %arg1: memref<8x8x3xbf16, #tpu.memory_space<vmem>>, %arg2: memref<2x3x32xbf16, #tpu.memory_space<vmem>>, %arg3: memref<1x1x32xf32, #tpu.memory_space<vmem>>, %arg4: memref<8x12x32xbf16, #tpu.memory_space<vmem>>) attributes {dimension_semantics = [#tpu.dimension_semantics<parallel>], iteration_bounds = array<i64: 2>, scalar_prefetch = 0 : i64, scratch_operands = 0 : i64, tpu.core_type = #tpu.core_type<tc>, window_params = [{transform_indices = @transform_0, window_bounds = array<i64: 8, 8, 3>}, {pipeline_mode = #tpu.pipeline_mode<synchronous>, transform_indices = @transform_1, window_bounds = array<i64: 2, 3, 32>}, {pipeline_mode = #tpu.pipeline_mode<synchronous>, transform_indices = @transform_2, window_bounds = array<i64: 1, 1, 32>}, {transform_indices = @transform_3, window_bounds = array<i64: 8, 12, 32>}]} {
    %c0 = arith.constant 0 : index
    %c0_0 = arith.constant 0 : index
    %c0_1 = arith.constant 0 : index
    %0 = vector.load %arg1[%c0, %c0_0, %c0_1] : memref<8x8x3xbf16, #tpu.memory_space<vmem>>, vector<8x7x3xbf16>
    %c0_2 = arith.constant 0 : index
    %c0_3 = arith.constant 0 : index
    %c0_4 = arith.constant 0 : index
    %1 = vector.load %arg2[%c0_2, %c0_3, %c0_4] : memref<2x3x32xbf16, #tpu.memory_space<vmem>>, vector<1x3x32xbf16>
    %2 = vector.shape_cast %1 : vector<1x3x32xbf16> to vector<3x32xbf16>
    %cst = arith.constant dense<0.000000e+00> : vector<8x7x32xf32>
    %3 = tpu.matmul %0, %2, %cst {dimension_numbers = #tpu.dot_dimension_numbers<[2], [0], [0, 1], [1], [0, 0, 0, 1, 1, 1], [], []>} : vector<8x7x3xbf16>, vector<3x32xbf16>, vector<8x7x32xf32> -> vector<8x7x32xf32>
    %c0_5 = arith.constant 0 : index
    %c1 = arith.constant 1 : index
    %c0_6 = arith.constant 0 : index
    %4 = vector.load %arg1[%c0_5, %c1, %c0_6] : memref<8x8x3xbf16, #tpu.memory_space<vmem>>, vector<8x7x3xbf16>
    %c1_7 = arith.constant 1 : index
    %c0_8 = arith.constant 0 : index
    %c0_9 = arith.constant 0 : index
    %5 = vector.load %arg2[%c1_7, %c0_8, %c0_9] : memref<2x3x32xbf16, #tpu.memory_space<vmem>>, vector<1x3x32xbf16>
    %6 = vector.shape_cast %5 : vector<1x3x32xbf16> to vector<3x32xbf16>
    %cst_10 = arith.constant dense<0.000000e+00> : vector<8x7x32xf32>
    %7 = tpu.matmul %4, %6, %cst_10 {dimension_numbers = #tpu.dot_dimension_numbers<[2], [0], [0, 1], [1], [0, 0, 0, 1, 1, 1], [], []>} : vector<8x7x3xbf16>, vector<3x32xbf16>, vector<8x7x32xf32> -> vector<8x7x32xf32>
    %8 = arith.addf %3, %7 : vector<8x7x32xf32>
    %c0_11 = arith.constant 0 : index
    %c0_12 = arith.constant 0 : index
    %c0_13 = arith.constant 0 : index
    %9 = vector.load %arg3[%c0_11, %c0_12, %c0_13] : memref<1x1x32xf32, #tpu.memory_space<vmem>>, vector<1x1x32xf32>
    %10 = vector.broadcast %9 : vector<1x1x32xf32> to vector<8x7x32xf32>
    %11 = arith.addf %8, %10 : vector<8x7x32xf32>
    %cst_14 = arith.constant 0.000000e+00 : f32
    %12 = vector.broadcast %cst_14 : f32 to vector<8x7x32xf32>
    %13 = arith.cmpf oge, %11, %12 : vector<8x7x32xf32>
    %cst_15 = arith.constant 1.000000e-01 : f32
    %14 = vector.broadcast %cst_15 : f32 to vector<8x7x32xf32>
    %15 = arith.mulf %11, %14 : vector<8x7x32xf32>
    %16 = arith.select %13, %11, %15 : vector<8x7x32xi1>, vector<8x7x32xf32>
    %17 = arith.truncf %16 : vector<8x7x32xf32> to vector<8x7x32xbf16>
    %cst_16 = arith.constant 0.000000e+00 : bf16
    %18 = vector.broadcast %cst_16 : bf16 to vector<8x2x32xbf16>
    %c0_17 = arith.constant 0 : index
    %c0_18 = arith.constant 0 : index
    %c0_19 = arith.constant 0 : index
    %19 = vector.load %arg4[%c0_17, %c0_18, %c0_19] : memref<8x12x32xbf16, #tpu.memory_space<vmem>>, vector<8x2x32xbf16>
    tpu.vector_store %arg4[%c0_17, %c0_18, %c0_19], %18 {strides = array<i32>} : memref<8x12x32xbf16, #tpu.memory_space<vmem>>, vector<8x2x32xbf16>,
    %c0_20 = arith.constant 0 : index
    %c2 = arith.constant 2 : index
    %c0_21 = arith.constant 0 : index
    %20 = vector.load %arg4[%c0_20, %c2, %c0_21] : memref<8x12x32xbf16, #tpu.memory_space<vmem>>, vector<8x7x32xbf16>
    tpu.vector_store %arg4[%c0_20, %c2, %c0_21], %17 {strides = array<i32>} : memref<8x12x32xbf16, #tpu.memory_space<vmem>>, vector<8x7x32xbf16>,
    %cst_22 = arith.constant 0.000000e+00 : bf16
    %21 = vector.broadcast %cst_22 : bf16 to vector<8x3x32xbf16>
    %c0_23 = arith.constant 0 : index
    %c9 = arith.constant 9 : index
    %c0_24 = arith.constant 0 : index
    %22 = vector.load %arg4[%c0_23, %c9, %c0_24] : memref<8x12x32xbf16, #tpu.memory_space<vmem>>, vector<8x3x32xbf16>
    tpu.vector_store %arg4[%c0_23, %c9, %c0_24], %21 {strides = array<i32>} : memref<8x12x32xbf16, #tpu.memory_space<vmem>>, vector<8x3x32xbf16>,
    return
  }
  func.func @transform_0(%arg0: i32) -> (i32, i32, i32) {
    %c0_i32 = arith.constant 0 : i32
    %c0_i32_0 = arith.constant 0 : i32
    %c0_i32_1 = arith.constant 0 : i32
    return %arg0, %c0_i32, %c0_i32_0 : i32, i32, i32
  }
  func.func @transform_1(%arg0: i32) -> (i32, i32, i32) {
    %c0_i32 = arith.constant 0 : i32
    %c0_i32_0 = arith.constant 0 : i32
    %c0_i32_1 = arith.constant 0 : i32
    %c0_i32_2 = arith.constant 0 : i32
    return %c0_i32, %c0_i32_0, %c0_i32_1 : i32, i32, i32
  }
  func.func @transform_2(%arg0: i32) -> (i32, i32, i32) {
    %c0_i32 = arith.constant 0 : i32
    %c0_i32_0 = arith.constant 0 : i32
    %c0_i32_1 = arith.constant 0 : i32
    %c0_i32_2 = arith.constant 0 : i32
    return %c0_i32, %c0_i32_0, %c0_i32_1 : i32, i32, i32
  }
  func.func @transform_3(%arg0: i32) -> (i32, i32, i32) {
    %c0_i32 = arith.constant 0 : i32
    %c0_i32_0 = arith.constant 0 : i32
    %c0_i32_1 = arith.constant 0 : i32
    return %arg0, %c0_i32, %c0_i32_0 : i32, i32, i32
  }
}

</mosaic_0001>

<bundles_post_ra>
// kernel: tpu_custom_call.1
= control target key start
LH: loop header
LB: loop body
LE: loop exit
PB: predicated region body
PF: predicated region fallthrough
CT: control target
= control target key end

     0   :  { %s2502_s12 = smov 0   ;;  %s3178_s0 = inlined_call_operand.vmem [shape: bf16[16,8,3], index: 0, kind: input, shape index: {}]   ;;  %s3179_s1 = inlined_call_operand.vmem [shape: bf16[2,3,32], index: 1, kind: input, shape index: {}]   ;;  %s3180_s2 = inlined_call_operand.vmem [shape: f32[1,1,32], index: 2, kind: input, shape index: {}]   ;;  %s3181_s3 = inlined_call_operand.vmem [shape: bf16[16,12,32], index: 3, kind: output, shape index: {}]  }
   0x1 LB: > { %s2346_s13 = sadd.s32 4294967295, %s2477_s12   ;;  %p2350_p0 = scmp.ge.s32.totalorder %s2477_s12, 1  ;;  %s2477_s12 = sphi %s2502_s12, %s13_s12  }
   0x2   : > { %p138_p1 = scmp.lt.s32.totalorder %s2477_s12, 3 }
   0x4   : > { %p139_p2 = pnand %p2350_p0, %p138_p1 }
   0x5   : > { %v185_v0 = vld [vmem:[%s3179_s1] sm:$0x3] (!%p139_p2)  ;;  %vm656_vm0 = vcmask (!%p139_p2), 1040384   ;;  %vm657_vm1 = vcmask (!%p139_p2), 1041408   ;;  %s2351_s16 = sshll.u32 (!%p139_p2), %s2346_s13, 3  ;;  %v207_v1 = vlaneseq (!%p139_p2)  ;;  %v2479_v2 = vmov (!%p139_p2), 65535  }
   0x6   : > { %142 = sbr.rel (%p139_p2) target bundleno = 402 (0x192), region = 32  ;;  %v658_v3 = vsel (!%p139_p2), %vm656_vm0, 4294967295, %v2479_v2  ;;  %v2356_v4 = vld [vmem:[%s3179_s1 + $0x2] sm:$0x3] (!%p139_p2)  ;;  %p164_p3 = scmp.lt.s32.totalorder (!%p139_p2), %s2351_s16, 15  ;;  %vm643_vm2 = vcmask (!%p139_p2), 23552  }
   0x7   : > { %v659_v5 = vsel (!%p139_p2), %vm657_vm1, %v658_v3, 0  ;;  %v2480_v6 = vmov (!%p139_p2), 1966171168   ;;  %v208_v8 = vshrl.u32 (!%p139_p2), %v207_v1, 7  ;;  %vm2160_vm3 = vcmask (!%p139_p2), 253952  }
   0x8   : > { %v205_v7 = vunpack.c.l.s4 (!%p139_p2), %v2480_v6  ;;  %v947_v9 = vand.u32 (!%p139_p2), %v659_v5, %v185_v0  ;;  %v661_v10 = vand.u32 (!%p139_p2), %v2356_v4, %v659_v5 }
   0xa   : > { %v206_v11 = vunpack.c.0.s8 (!%p139_p2), %v205_v7  ;;  %2443 = vmatprep.subr.bf16.mxu0 (!%p139_p2), %v947_v9  ;;  %2433 = vmatprep.subr.bf16.mxu1 (!%p139_p2), %v661_v10 }
   0xb   : > { %2444 = vmatpush3.bf16.msra.mxu0 (!%p139_p2), %v947_v9  ;;  %2434 = vmatpush3.bf16.msra.mxu1 (!%p139_p2), %v661_v10 }
   0xc   : > { %v2524_v12 = vsub.s32 (!%p139_p2), %v206_v11, %v208_v8 }
   0xd   : > { %s3187_s16 = smov (!%p164_p3, %s2351_s16), 15 }
   0xe   : > { %s2352_s19 = sshll.u32 %s3187_s16, 2  ;;  %s2414_s23 = sshll.u32 %s3187_s16, 3 }
   0xf   : > { %s2522_s22 = scalar_lea.vmem %s3178_s0, %s2352_s19  ;;  %s2721_s26 = scalar_lea.vmem %s3181_s3, %s2414_s23 }
  0x10   : > { %v2357_v13 = vld.sshfl [vmem:[%s2522_s22] sm:$0x33 pattern:$0x75316420] }
  0x11   : > { %v2358_v14 = vld.sshfl [vmem:[%s2522_s22 + $0x4] sm:$0x33 pattern:$0x75316420]  ;;  %v203_v15 = vcombine.high %v2357_v13, %v2357_v13  ;;  %v2529_v16 = vrot.slane %v2357_v13, %v2524_v12 }
  0x12   : > { %v2359_v17 = vld.sshfl [vmem:[%s2522_s22 + $0x8] sm:$0x33 pattern:$0x75316420]  ;;  %v227_v18 = vcombine.high %v2358_v14, %v2358_v14  ;;  %v2533_v19 = vrot.slane %v2358_v14, %v2524_v12 }
  0x13   : > { %v2536_v20 = vrot.slane %v203_v15, %v2524_v12  ;;  %v2540_v21 = vcombine.high %v2529_v16, %v2529_v16  ;;  %v251_v22 = vcombine.high %v2359_v17, %v2359_v17  ;;  %v2543_v23 = vrot.slane %v2359_v17, %v2524_v12  ;;  %v2360_v24 = vld.sshfl [vmem:[%s2522_s22 + $0xc] sm:$0x33 pattern:$0x75316420] }
  0x14   : > { %v2547_v25 = vrot.slane %v227_v18, %v2524_v12  ;;  %v2551_v26 = vcombine.high %v2533_v19, %v2533_v19  ;;  %v395_v27 = vunpack.i.h.s16 %v2533_v19  ;;  %v275_v28 = vcombine.high %v2360_v24, %v2360_v24  ;;  %v2361_v33 = vld.sshfl [vmem:[%s2522_s22 + $0x10] sm:$0x33 pattern:$0x75316420] }
  0x15   : > { %v219_v29 = vcombine.high %v2536_v20, %v2536_v20  ;;  %v2557_v30 = vrot.slane %v251_v22, %v2524_v12  ;;  %v2561_v31 = vcombine.high %v2543_v23, %v2543_v23  ;;  %v763_v32 = vcombine.low %v2529_v16, %v2536_v20 }
  0x16   : > { %v2568_v34 = vcombine.high %v2547_v25, %v2547_v25  ;;  %v397_v35 = vunpack.i.h.s16 %v2547_v25  ;;  %v399_v36 = vunpack.i.h.s16 %v2551_v26  ;;  %v2384_v37 = vpack.i.b16 %v2547_v25, %v395_v27 }
  0x17   : > { %v2383_v38 = vpack.i.b16 %v2533_v19, %v219_v29  ;;  %v773_v39 = vrot.slane %v763_v32, %v2524_v12  ;;  %v2577_v40 = vcombine.high %v2557_v30, %v2557_v30  ;;  %v2580_v41 = vrot.slane %v2360_v24, %v2524_v12 }
  0x18   : > { %v2385_v42 = vpack.i.b16 %v2551_v26, %v397_v35  ;;  %v2386_v43 = vpack.i.b16 %v2568_v34, %v399_v36  ;;  %v2585_v44 = vrot.slane %v275_v28, %v2524_v12  ;;  %v299_v45 = vcombine.high %v2361_v33, %v2361_v33 }
  0x19   : > { %v764_v46 = vcombine.low %v2540_v21, %v2383_v38  ;;  %v290_v47 = vcombine.high %v2580_v41, %v2580_v41  ;;  %v2591_v48 = vrot.slane %v2361_v33, %v2524_v12  ;;  %v409_v49 = vunpack.i.h.s16 %v2580_v41 }
  0x1a   : > { %v765_v50 = vcombine.low %v2384_v37, %v2385_v42  ;;  %v766_v51 = vcombine.low %v2386_v43, %v2543_v23  ;;  %v291_v52 = vcombine.high %v2585_v44, %v2585_v44  ;;  %v2598_v53 = vrot.slane %v299_v45, %v2524_v12 }
  0x1b   : > { %v780_v54 = vrot.slane %v764_v46, %v2524_v12  ;;  %v411_v55 = vunpack.i.h.s16 %v2585_v44  ;;  %v413_v56 = vunpack.i.h.s16 %v290_v47  ;;  %v2387_v57 = vpack.i.b16 %v2580_v41, %v2577_v40 }
  0x1c   : > { %v787_v58 = vrot.slane %v765_v50, %v2524_v12  ;;  %v794_v59 = vrot.slane %v766_v51, %v2524_v12  ;;  %v2388_v60 = vpack.i.b16 %v2585_v44, %v409_v49  ;;  %v812_v61 = vcombine.low %v2557_v30, %v2561_v31 }
  0x1d   : > { %v795_v62 = vcombine.low %v773_v39, %v780_v54  ;;  %v2389_v63 = vpack.i.b16 %v290_v47, %v411_v55  ;;  %v2390_v0 = vpack.i.b16 %v291_v52, %v413_v56  ;;  %v815_v1 = vcombine.low %v2591_v48, %v2598_v53  ;;  %v2362_v47 = vld.sshfl [vmem:[%s2522_s22 + $0x14] sm:$0x33 pattern:$0x75316420] }
  0x1e   : > { %v796_v2 = vcombine.low %v787_v58, %v794_v59  ;;  %v813_v3 = vcombine.low %v2387_v57, %v2388_v60  ;;  %v822_v4 = vrot.slane %v812_v61, %v2524_v12  ;;  %v388_v5 = vunpack.i.h.s16 %v2529_v16  ;;  %v2363_v57 = vld.sshfl [vmem:[%s2522_s22 + $0x18] sm:$0x33 pattern:$0x75316420] }
  0x1f   : > { %v803_v6 = vrot.slane %v795_v62, %v2524_v12  ;;  %v814_v7 = vcombine.low %v2389_v63, %v2390_v0  ;;  %v843_v8 = vrot.slane %v815_v1, %v2524_v12  ;;  %v390_v9 = vunpack.i.h.s16 %v2536_v20 }
  0x20   : > { %v810_v10 = vrot.slane %v796_v2, %v2524_v12  ;;  %v829_v11 = vrot.slane %v813_v3, %v2524_v12  ;;  %v392_v13 = vunpack.i.h.s16 %v2540_v21  ;;  %v394_v14 = vunpack.i.h.s16 %v219_v29 }
  0x21   : > { %v836_v15 = vrot.slane %v814_v7, %v2524_v12  ;;  %v402_v17 = vunpack.i.h.s16 %v2543_v23  ;;  %v2365_v16 = vpack.i.b16 %v2536_v20, %v388_v5  ;;  %v2366_v18 = vpack.i.b16 %v2540_v21, %v390_v9 }
  0x22   : > { %v811_v19 = vcombine.low %v803_v6, %v810_v10  ;;  %v844_v22 = vcombine.low %v822_v4, %v829_v11  ;;  %v2367_v24 = vpack.i.b16 %v219_v29, %v392_v13  ;;  %v447_v28 = vpack.i.b16 %v395_v27, %v394_v14  ;;  %v2364_v14 = vld.sshfl [vmem:[%s2522_s22 + $0x1c] sm:$0x33 pattern:$0x75316420] }
  0x23   : > { %v845_v32 = vcombine.low %v836_v15, %v843_v8  ;;  %v2368_v33 = vpack.i.b16 %v2557_v30, %v402_v17  ;;  %v472_v35 = vcombine.low %v2365_v16, %v2366_v18  ;;  %v474_v36 = vcombine.low %v2547_v25, %v2551_v26 }
  0x24   : > { %2445 = vmatprep.mubr.msk.bf16.mxu0 %vm643_vm2, %v811_v19  ;;  %v852_v37 = vrot.slane %v844_v22, %v2524_v12  ;;  %v473_v23 = vcombine.low %v2367_v24, %v447_v28  ;;  %v2630_v20 = vcombine.high %v2591_v48, %v2591_v48  ;;  %v404_v21 = vunpack.i.h.s16 %v2557_v30 }
  0x25   : > { %v859_v27 = vrot.slane %v845_v32, %v2524_v12  ;;  %v475_v29 = vcombine.low %v2568_v34, %v2368_v33  ;;  %v482_v38 = vrot.slane %v472_v35, %v2524_v12  ;;  %v496_v25 = vrot.slane %v474_v36, %v2524_v12 }
  0x26   : > { %v489_v26 = vrot.slane %v473_v23, %v2524_v12  ;;  %v406_v39 = vunpack.i.h.s16 %v2561_v31  ;;  %v408_v42 = vunpack.i.h.s16 %v2577_v40  ;;  %v416_v43 = vunpack.i.h.s16 %v2591_v48 }
  0x27   : > { %v860_v45 = vcombine.low %v852_v37, %v859_v27  ;;  %v503_v30 = vrot.slane %v475_v29, %v2524_v12  ;;  %v418_v46 = vunpack.i.h.s16 %v2598_v53  ;;  %v2369_v34 = vpack.i.b16 %v2561_v31, %v404_v21 }
  0x28   : > { %v504_v50 = vcombine.low %v482_v38, %v489_v26  ;;  %v2370_v51 = vpack.i.b16 %v2577_v40, %v406_v39  ;;  %v454_v52 = vpack.i.b16 %v409_v49, %v408_v42  ;;  %v2371_v54 = vpack.i.b16 %v2598_v53, %v416_v43 }
  0x29   : > { %2446 = vmatmul.mubr.msk.bf16.vlgmr.msra.gmra.mrb[0].mxu0 %vm643_vm2, %v860_v45  ;;  %v505_v55 = vcombine.low %v496_v25, %v503_v30  ;;  %v2372_v56 = vpack.i.b16 %v2630_v20, %v418_v46  ;;  %v2377_v48 = vcombine.high %v2580_v41, %v2585_v44  ;;  %v2654_v58 = vcombine.high %v2598_v53, %v2598_v53 }
  0x2a   : > { %v512_v31 = vrot.slane %v504_v50, %v2524_v12  ;;  %v521_v59 = vcombine.low %v2369_v34, %v2370_v51  ;;  %v522_v40 = vcombine.low %v454_v52, %v2585_v44  ;;  %v323_v49 = vcombine.high %v2362_v47, %v2362_v47 }
  0x2b   : > { %v519_v60 = vrot.slane %v505_v55, %v2524_v12  ;;  %v524_v61 = vcombine.low %v2371_v54, %v2372_v56  ;;  %v545_v62 = vrot.slane %v2377_v48, %v2524_v12  ;;  %v330_v63 = vrot.slane %v2362_v47, %v2524_v12 }
  0x2c   : > { %v531_v41 = vrot.slane %v521_v59, %v2524_v12  ;;  %v538_v0 = vrot.slane %v522_v40, %v2524_v12  ;;  %v2664_v53 = vrot.slane %v323_v49, %v2524_v12  ;;  %v347_v1 = vcombine.high %v2363_v57, %v2363_v57 }
  0x2d   : > { %v520_v2 = vcombine.low %v512_v31, %v519_v60  ;;  %v552_v44 = vrot.slane %v524_v61, %v2524_v12  ;;  %v2667_v3 = vcombine.high %v330_v63, %v330_v63  ;;  %v354_v4 = vrot.slane %v2363_v57, %v2524_v12 }
  0x2e   : > { %v553_v5 = vcombine.low %v531_v41, %v538_v0  ;;  %v2672_v6 = vcombine.high %v2664_v53, %v2664_v53  ;;  %v361_v7 = vrot.slane %v347_v1, %v2524_v12  ;;  %v423_v8 = vunpack.i.h.s16 %v330_v63 }
  0x2f   : > { %2435 = vmatprep.mubr.msk.bf16.mxu1 %vm643_vm2, %v520_v2  ;;  %v554_v9 = vcombine.low %v545_v62, %v552_v44  ;;  %v362_v10 = vcombine.high %v354_v4, %v354_v4  ;;  %v425_v11 = vunpack.i.h.s16 %v2664_v53  ;;  %v427_v13 = vunpack.i.h.s16 %v2667_v3 }
  0x30   : > { %v561_v15 = vrot.slane %v553_v5, %v2524_v12  ;;  %v2391_v17 = vpack.i.b16 %v330_v63, %v2654_v58  ;;  %v2392_v16 = vpack.i.b16 %v2664_v53, %v423_v8  ;;  %v363_v18 = vcombine.high %v361_v7, %v361_v7 }
  0x31   : > { %v568_v19 = vrot.slane %v554_v9, %v2524_v12  ;;  %v2393_v22 = vpack.i.b16 %v2667_v3, %v425_v11  ;;  %v2394_v24 = vpack.i.b16 %v2672_v6, %v427_v13  ;;  %v864_v28 = vcombine.low %v361_v7, %v362_v10 }
  0x32   : > { %v861_v32 = vcombine.low %v2630_v20, %v2391_v17  ;;  %v371_v33 = vcombine.high %v2364_v14, %v2364_v14  ;;  %v378_v35 = vrot.slane %v2364_v14, %v2524_v12  ;;  %v420_v36 = vunpack.i.h.s16 %v2630_v20 }
  0x33   : > { %v569_v37 = vcombine.low %v561_v15, %v568_v19  ;;  %v862_v23 = vcombine.low %v2392_v16, %v2393_v22  ;;  %v863_v21 = vcombine.low %v2394_v24, %v354_v4  ;;  %v892_v27 = vrot.slane %v864_v28, %v2524_v12 }
  0x34   : > { %v871_v29 = vrot.slane %v861_v32, %v2524_v12  ;;  %v385_v38 = vrot.slane %v371_v33, %v2524_v12  ;;  %v386_v25 = vcombine.high %v378_v35, %v378_v35  ;;  %v437_v26 = vunpack.i.h.s16 %v378_v35 }
  0x35   : > { %2436 = vmatmul.mubr.msk.bf16.vlgmr.msra.gmra.mrb[0].mxu1 %vm643_vm2, %v569_v37  ;;  %v878_v39 = vrot.slane %v862_v23, %v2524_v12  ;;  %v885_v42 = vrot.slane %v863_v21, %v2524_v12  ;;  %v2395_v43 = vpack.i.b16 %v378_v35, %v363_v18  ;;  %v422_v20 = vunpack.i.h.s16 %v2654_v58 }
  0x36   : > { %v387_v45 = vcombine.high %v385_v38, %v385_v38  ;;  %v439_v30 = vunpack.i.h.s16 %v385_v38  ;;  %v441_v46 = vunpack.i.h.s16 %v386_v25  ;;  %v2396_v34 = vpack.i.b16 %v385_v38, %v437_v26 }
  0x37   : > { %v893_v47 = vcombine.low %v871_v29, %v878_v39  ;;  %v894_v50 = vcombine.low %v885_v42, %v892_v27  ;;  %v430_v51 = vunpack.i.h.s16 %v354_v4  ;;  %v432_v52 = vunpack.i.h.s16 %v361_v7 }
  0x38   : > { %v2397_v54 = vpack.i.b16 %v386_v25, %v439_v30  ;;  %v2398_v55 = vpack.i.b16 %v387_v45, %v441_v46  ;;  %v910_v56 = vcombine.low %v2395_v43, %v2396_v34  ;;  %v434_v48 = vunpack.i.h.s16 %v362_v10 }
  0x39   : > { %v901_v57 = vrot.slane %v893_v47, %v2524_v12  ;;  %v908_v31 = vrot.slane %v894_v50, %v2524_v12  ;;  %v2373_v59 = vpack.i.b16 %v2654_v58, %v420_v36  ;;  %v461_v40 = vpack.i.b16 %v423_v8, %v422_v20 }
  0x3a   : > { %v911_v49 = vcombine.low %v2397_v54, %v2398_v55  ;;  %v918_v60 = vrot.slane %v910_v56, %v2524_v12  ;;  %v2374_v61 = vpack.i.b16 %v361_v7, %v430_v51  ;;  %v2375_v62 = vpack.i.b16 %v362_v10, %v432_v52 }
  0x3b   : > { %v909_v63 = vcombine.low %v901_v57, %v908_v31  ;;  %v2376_v41 = vpack.i.b16 %v363_v18, %v434_v48  ;;  %v570_v0 = vcombine.low %v2373_v59, %v461_v40  ;;  %v571_v1 = vcombine.low %v2664_v53, %v2667_v3 }
  0x3c   : > { %v925_v2 = vrot.slane %v911_v49, %v2524_v12  ;;  %v572_v44 = vcombine.low %v2672_v6, %v2374_v61  ;;  %v436_v4 = vunpack.i.h.s16 %v363_v18  ;;  %v2378_v5 = vcombine.high %v378_v35, %v385_v38  ;;  %v2403_v35 = vld [vmem:[%s3180_s2] ss:$0 sm:$0xff] }
  0x3d   : > { %2449 = vmatprep.mubr.msk.bf16.mxu0 %vm643_vm2, %v909_v63  ;;  %v573_v58 = vcombine.low %v2375_v62, %v2376_v41  ;;  %v580_v8 = vrot.slane %v570_v0, %v2524_v12  ;;  %v587_v7 = vrot.slane %v571_v1, %v2524_v12  ;;  %v2481_v28 = vmov 0  }
  0x3e   : > { %v926_v9 = vcombine.low %v918_v60, %v925_v2  ;;  %v594_v10 = vrot.slane %v572_v44, %v2524_v12  ;;  %v468_v11 = vpack.i.b16 %v437_v26, %v436_v4  ;;  %v634_v14 = vrot.slane %v2378_v5, %v2524_v12  ;;  %2161 = vst.msk [vmem:[%s2721_s26] sm:$0x1] %vm2160_vm3, %v2481_v28 }
  0x3f   : > { %v601_v53 = vrot.slane %v573_v58, %v2524_v12  ;;  %v602_v3 = vcombine.low %v580_v8, %v587_v7  ;;  %2162 = vst.msk [vmem:[%s2721_s26 + $0x8] sm:$0x1] %vm2160_vm3, %v2481_v28  ;;  %2163 = vst.msk [vmem:[%s2721_s26 + $0x10] sm:$0x1] %vm2160_vm3, %v2481_v28  ;;  %v1432_v23 = vrot.slane %v2403_v35, %v2524_v12 }
  0x40   : > { %v933_v13 = vrot.slane %v926_v9, %v2524_v12  ;;  %v619_v6 = vcombine.low %v468_v11, %v385_v38  ;;  %2164 = vst.msk [vmem:[%s2721_s26 + $0x18] sm:$0x1] %vm2160_vm3, %v2481_v28  ;;  %2165 = vst.msk [vmem:[%s2721_s26 + $0x20] sm:$0x1] %vm2160_vm3, %v2481_v28  ;;  %v1425_v21 = vcombine.high %v2403_v35, %v2403_v35 }
  0x41   : > { %v603_v15 = vcombine.low %v594_v10, %v601_v53  ;;  %v610_v17 = vrot.slane %v602_v3, %v2524_v12  ;;  %2166 = vst.msk [vmem:[%s2721_s26 + $0x28] sm:$0x1] %vm2160_vm3, %v2481_v28  ;;  %2167 = vst.msk [vmem:[%s2721_s26 + $0x30] sm:$0x1] %vm2160_vm3, %v2481_v28  ;;  %v1440_v27 = vcombine.high %v1432_v23, %v1432_v23 }
  0x42   : > { %2450 = vmatmul.mubr.msk.bf16.gmra.mrb[4].mxu0 %vm643_vm2, %v933_v13  ;;  %v627_v16 = vrot.slane %v619_v6, %v2524_v12  ;;  %2168 = vst.msk [vmem:[%s2721_s26 + $0x38] sm:$0x1] %vm2160_vm3, %v2481_v28  ;;  %v1439_v29 = vrot.slane %v1425_v21, %v2524_v12  ;;  %v2745_v25 = vrot.slane %v1432_v23, %v2524_v12 }
  0x43   : > { %v617_v18 = vrot.slane %v603_v15, %v2524_v12  ;;  %v2748_v39 = vrot.slane %v1440_v27, %v2524_v12 }
  0x44   : > { %v635_v19 = vcombine.low %v627_v16, %v634_v14  ;;  %v1441_v43 = vcombine.high %v1439_v29, %v1439_v29  ;;  %v2751_v20 = vrot.slane %v1439_v29, %v2524_v12  ;;  %v2758_v51 = vcombine.high %v2745_v25, %v2745_v25 }
  0x45   : > { %v618_v22 = vcombine.low %v610_v17, %v617_v18  ;;  %v2767_v31 = vcombine.high %v2748_v39, %v2748_v39 }
  0x46   : > { %v642_v24 = vrot.slane %v635_v19, %v2524_v12  ;;  %v2770_v59 = vrot.slane %v1441_v43, %v2524_v12  ;;  %v2774_v40 = vcombine.high %v2751_v20, %v2751_v20 }
  0x47   : > { %2439 = vmatprep.mubr.msk.bf16.mxu1 %vm643_vm2, %v618_v22 }
  0x48   : > { %2440 = vmatmul.mubr.msk.bf16.gmra.mrb[4].mxu1 %vm643_vm2, %v642_v24  ;;  %vm2228_vm2 = vsmask.f32 256 }
  0xfc   : > { %v2447_v32 = vpop.f32.mrb[0].mxu0 }
  0xfd   : > { %v983_v33 = vpop.f32.mrb[1].mxu0 }
  0xfe   : > { %v2448_v36 = vpop.f32.mrb[2].mxu0 }
  0xff   : > { %v986_v37 = vpop.f32.mrb[3].mxu0 }
 0x108   : > { %v2437_v38 = vpop.f32.mrb[0].mxu1 }
 0x109   : > { %v992_v26 = vadd.f32 %v2447_v32, %v2437_v38  ;;  %v697_v42 = vpop.f32.mrb[1].mxu1 }
 0x10a   : > { %v984_v45 = vadd.f32 %v983_v33, %v697_v42  ;;  %v2438_v30 = vpop.f32.mrb[2].mxu1 }
 0x10b   : > { %v1118_v46 = vcombine.high %v992_v26, %v992_v26  ;;  %v1125_v34 = vrot.slane %v992_v26, %v2524_v12  ;;  %v2754_v47 = vadd.f32 %v2448_v36, %v2438_v30  ;;  %v700_v50 = vpop.f32.mrb[3].mxu1 }
 0x10c   : > { %v1020_v52 = vcombine.high %v984_v45, %v984_v45  ;;  %v1027_v54 = vrot.slane %v984_v45, %v2524_v12  ;;  %v2761_v55 = vadd.f32 %v986_v37, %v700_v50 }
 0x10d   : > { %v1132_v56 = vrot.slane %v1118_v46, %v2524_v12  ;;  %v1133_v48 = vcombine.high %v1125_v34, %v1125_v34  ;;  %v1141_v57 = vrot.slane %v1125_v34, %v2524_v12  ;;  %v1167_v1 = vcombine.high %v2754_v47, %v2754_v47 }
 0x10e   : > { %v1034_v41 = vrot.slane %v1020_v52, %v2524_v12  ;;  %v1035_v0 = vcombine.high %v1027_v54, %v1027_v54  ;;  %v1043_v7 = vrot.slane %v1027_v54, %v2524_v12  ;;  %v2789_v9 = vrot.slane %v2754_v47, %v2524_v12 }
 0x10f   : > { %v1134_v49 = vcombine.high %v1132_v56, %v1132_v56  ;;  %v1148_v60 = vrot.slane %v1132_v56, %v2524_v12  ;;  %v1155_v61 = vrot.slane %v1133_v48, %v2524_v12  ;;  %v1163_v62 = vcombine.high %v1141_v57, %v1141_v57 }
 0x110   : > { %v1496_v63 = vadd.f32 %v2758_v51, %v1141_v57  ;;  %v1036_v19 = vcombine.high %v1034_v41, %v1034_v41  ;;  %v1050_v28 = vrot.slane %v1034_v41, %v2524_v12  ;;  %v1057_v32 = vrot.slane %v1035_v0, %v2524_v12 }
 0x111   : > { %v1162_v2 = vrot.slane %v1134_v49, %v2524_v12  ;;  %v1164_v44 = vcombine.high %v1148_v60, %v1148_v60  ;;  %v1165_v4 = vcombine.high %v1155_v61, %v1155_v61  ;;  %v1497_v5 = vadd.f32 %v2767_v31, %v1155_v61 }
 0x112   : > { %v1498_v58 = vadd.f32 %v2751_v20, %v1163_v62  ;;  %v1500_v8 = vadd.f32 %v2774_v40, %v1148_v60  ;;  %vm1552_vm4 = vcmp.ge.f32.partialorder %v1496_v63, 0.0  ;;  %v1608_v13 = vmul.f32 0.1, %v1496_v63 }
 0x113   : > { %v1166_v10 = vcombine.high %v1162_v2, %v1162_v2  ;;  %v1499_v11 = vadd.f32 %v2770_v59, %v1165_v4  ;;  %v1501_v53 = vadd.f32 %v2745_v25, %v1162_v2  ;;  %v1502_v3 = vadd.f32 %v2748_v39, %v1164_v44 }
 0x114   : > { %vm1553_vm5 = vcmp.ge.f32.partialorder %v1497_v5, 0.0  ;;  %v1609_v6 = vmul.f32 0.1, %v1497_v5  ;;  %vm1554_vm6 = vcmp.ge.f32.partialorder %v1498_v58, 0.0  ;;  %vm1556_vm8 = vcmp.ge.f32.partialorder %v1500_v8, 0.0 }
 0x115   : > { %v2795_v14 = vadd.f32 %v2758_v51, %v1166_v10  ;;  %vm1555_vm7 = vcmp.ge.f32.partialorder %v1499_v11, 0.0  ;;  %v2797_v15 = vpop.f32.mrb[4].mxu0  ;;  %v1610_v17 = vmul.f32 0.1, %v1498_v58  ;;  %v1611_v16 = vmul.f32 0.1, %v1499_v11 }
 0x116   : > { %v1612_v18 = vmul.f32 0.1, %v1500_v8  ;;  %v1613_v22 = vmul.f32 0.1, %v1501_v53  ;;  %v1665_v24 = vsel %vm1553_vm5, %v1497_v5, %v1609_v6  ;;  %vm1557_vm9 = vcmp.ge.f32.partialorder %v1501_v53, 0.0  ;;  %v2801_v36 = vpop.f32.mrb[5].mxu0 }
 0x117   : > { %vm1558_vm10 = vcmp.ge.f32.partialorder %v1502_v3, 0.0  ;;  %v1614_v33 = vmul.f32 0.1, %v1502_v3  ;;  %v1667_v35 = vsel %vm1555_vm7, %v1499_v11, %v1611_v16  ;;  %v2804_v37 = vmul.f32 0.1, %v2795_v14  ;;  %v2452_v29 = vpop.f32.mrb[6].mxu0 }
 0x118   : > { %v1664_v23 = vsel %vm1552_vm4, %v1496_v63, %v1608_v13  ;;  %v1666_v21 = vsel %vm1554_vm6, %v1498_v58, %v1610_v17  ;;  %v2809_v27 = vsel %vm1556_vm8, %v1500_v8, %v1612_v18  ;;  %v1064_v42 = vrot.slane %v1036_v19, %v2524_v12  ;;  %v2812_v45 = vpop.f32.mrb[7].mxu0 }
 0x119   : > { %v1857_v38 = vcombine.low %v1664_v23, %v1665_v24  ;;  %v1858_v26 = vcombine.low %v1666_v21, %v1667_v35  ;;  %v1065_v43 = vcombine.high %v1043_v7, %v1043_v7  ;;  %v2814_v30 = vsel %vm1557_vm9, %v1501_v53, %v1613_v22 }
 0x11a   : > { %v1066_v46 = vcombine.high %v1050_v28, %v1050_v28  ;;  %v1067_v34 = vcombine.high %v1057_v32, %v1057_v32  ;;  %v1480_v50 = vadd.f32 %v2745_v25, %v1043_v7  ;;  %v2820_v54 = vsel %vm1558_vm10, %v1502_v3, %v1614_v33 }
 0x11b   : > { %v2817_v52 = vpop.f32.mrb[4].mxu1  ;;  %v1481_v56 = vadd.f32 %v2748_v39, %v1057_v32  ;;  %v1482_v48 = vadd.f32 %v2758_v51, %v1065_v43  ;;  %v1484_v57 = vadd.f32 %v2751_v20, %v1050_v28  ;;  %v1886_v60 = vrot.slane %v2809_v27, %v2524_v12 }
 0x11c   : > { %v2825_v49 = vpop.f32.mrb[5].mxu1  ;;  %v1483_v61 = vadd.f32 %v2767_v31, %v1067_v34  ;;  %v1485_v62 = vadd.f32 %v2770_v59, %v1064_v42  ;;  %v1486_v63 = vadd.f32 %v2774_v40, %v1066_v46  ;;  %v2833_v0 = vrot.slane %v1857_v38, %v2524_v12 }
 0x11d   : > { %v2442_v41 = vpop.f32.mrb[6].mxu1  ;;  %v1879_v2 = vrot.slane %v1858_v26, %v2524_v12  ;;  %v1068_v44 = vcombine.high %v1064_v42, %v1064_v42  ;;  %vm1536_vm11 = vcmp.ge.f32.partialorder %v1480_v50, 0.0  ;;  %vm1537_vm12 = vcmp.ge.f32.partialorder %v1481_v56, 0.0 }
 0x11e   : > { %v2836_v4 = vpop.f32.mrb[7].mxu1  ;;  %vm1538_vm13 = vcmp.ge.f32.partialorder %v1482_v48, 0.0  ;;  %vm1539_vm14 = vcmp.ge.f32.partialorder %v1483_v61, 0.0  ;;  %vm1540_vm15 = vcmp.ge.f32.partialorder %v1484_v57, 0.0  ;;  %vm1541_vm0 = vcmp.ge.f32.partialorder %v1485_v62, 0.0 }
 0x11f   : > { %vm1542_vm1 = vcmp.ge.f32.partialorder %v1486_v63, 0.0  ;;  %v1592_v5 = vmul.f32 0.1, %v1480_v50  ;;  %v1593_v58 = vmul.f32 0.1, %v1481_v56  ;;  %v1181_v11 = vrot.slane %v1167_v1, %v2524_v12 }
 0x120   : > { %v1594_v8 = vmul.f32 0.1, %v1482_v48  ;;  %v1595_v7 = vmul.f32 0.1, %v1483_v61  ;;  %v1596_v10 = vmul.f32 0.1, %v1484_v57  ;;  %v1182_v6 = vcombine.high %v2789_v9, %v2789_v9 }
 0x121   : > { %v1597_v53 = vmul.f32 0.1, %v1485_v62  ;;  %v1598_v3 = vmul.f32 0.1, %v1486_v63  ;;  %v1648_v13 = vsel %vm1536_vm11, %v1480_v50, %v1592_v5  ;;  %v1649_v17 = vsel %vm1537_vm12, %v1481_v56, %v1593_v58 }
 0x122   : > { %v1650_v16 = vsel %vm1538_vm13, %v1482_v48, %v1594_v8  ;;  %v1651_v18 = vsel %vm1539_vm14, %v1483_v61, %v1595_v7  ;;  %v1652_v19 = vsel %vm1540_vm15, %v1484_v57, %v1596_v10  ;;  %v1760_v1 = vcombine.low %v1648_v13, %v1649_v17  ;;  %vm2889_vm14 = vmand %vm2160_vm3, %vm2228_vm2 }
 0x123   : > { %v1653_v22 = vsel %vm1541_vm0, %v1485_v62, %v1597_v53  ;;  %v1654_v47 = vsel %vm1542_vm1, %v1486_v63, %v1598_v3  ;;  %v1761_v24 = vcombine.low %v1650_v16, %v1651_v18  ;;  %v2852_v28 = vadd.f32 %v2745_v25, %v1068_v44 }
 0x124   : > { %v1762_v32 = vcombine.low %v1652_v19, %v1653_v22  ;;  %v1183_v33 = vcombine.high %v1181_v11, %v1181_v11  ;;  %v1190_v35 = vrot.slane %v2789_v9, %v2524_v12  ;;  %v1769_v23 = vrot.slane %v1760_v1, %v2524_v12 }
 0x125   : > { %v1776_v21 = vrot.slane %v1761_v24, %v2524_v12  ;;  %v1197_v27 = vrot.slane %v1181_v11, %v2524_v12  ;;  %v1204_v29 = vrot.slane %v1182_v6, %v2524_v12  ;;  %v1790_v26 = vrot.slane %v1654_v47, %v2524_v12 }
 0x126   : > { %v1783_v38 = vrot.slane %v1762_v32, %v2524_v12  ;;  %v1211_v42 = vrot.slane %v1183_v33, %v2524_v12  ;;  %v1212_v43 = vcombine.high %v1190_v35, %v1190_v35  ;;  %vm2225_vm4 = vcmask 257025  }
 0x127   : > { %v1791_v46 = vcombine.low %v1769_v23, %v1776_v21  ;;  %v1214_v34 = vcombine.high %v1204_v29, %v1204_v29  ;;  %v1504_v9 = vadd.f32 %v2767_v31, %v1190_v35  ;;  %v1505_v50 = vadd.f32 %v2751_v20, %v1204_v29 }
 0x128   : > { %v1792_v56 = vcombine.low %v1783_v38, %v1790_v26  ;;  %v1215_v48 = vcombine.high %v1211_v42, %v1211_v42  ;;  %v1506_v57 = vadd.f32 %v2770_v59, %v1212_v43  ;;  %v1508_v61 = vadd.f32 %v2745_v25, %v1197_v27 }
 0x129   : > { %v1904_v62 = vcombine.low %v2814_v30, %v2820_v54  ;;  %v1799_v63 = vrot.slane %v1791_v46, %v2524_v12  ;;  %v1213_v41 = vcombine.high %v1197_v27, %v1197_v27  ;;  %v1507_v44 = vadd.f32 %v2774_v40, %v1214_v34 }
 0x12a   : > { %v2871_v5 = vcombine.low %v1879_v2, %v1886_v60  ;;  %v2874_v58 = vmul.f32 0.1, %v2852_v28  ;;  %v1806_v8 = vrot.slane %v1792_v56, %v2524_v12  ;;  %v1509_v7 = vadd.f32 %v2748_v39, %v1211_v42 }
 0x12b   : > { %v1511_v10 = vadd.f32 %v2767_v31, %v1215_v48  ;;  %vm1559_vm5 = vcmp.ge.f32.partialorder %v2795_v14, 0.0  ;;  %vm1560_vm6 = vcmp.ge.f32.partialorder %v1504_v9, 0.0  ;;  %vm1561_vm7 = vcmp.ge.f32.partialorder %v1505_v50, 0.0 }
 0x12c   : > { %v1807_v30 = vcombine.low %v1799_v63, %v1806_v8  ;;  %vm1562_vm8 = vcmp.ge.f32.partialorder %v1506_v57, 0.0  ;;  %vm1563_vm9 = vcmp.ge.f32.partialorder %v1507_v44, 0.0  ;;  %vm1564_vm10 = vcmp.ge.f32.partialorder %v1508_v61, 0.0 }
 0x12d   : > { %v1510_v54 = vadd.f32 %v2758_v51, %v1213_v41  ;;  %v1616_v60 = vmul.f32 0.1, %v1504_v9  ;;  %v1617_v2 = vmul.f32 0.1, %v1505_v50  ;;  %v1618_v11 = vmul.f32 0.1, %v1506_v57 }
 0x12e   : > { %v2415_v53 = vpack.c.bf16 %v1807_v30, %v1807_v30  ;;  %v1619_v3 = vmul.f32 0.1, %v1507_v44  ;;  %v1621_v13 = vmul.f32 0.1, %v1509_v7  ;;  %v1671_v6 = vsel %vm1559_vm5, %v2795_v14, %v2804_v37  ;;  %v2230_v14 = vld [vmem:[%s2721_s26 + $0x4] sm:$0x1] }
 0x12f   : > { %vm2261_vm11 = vcmask 254976   ;;  %vm2262_vm12 = vsmask.f32 7938  ;;  %vm1565_vm13 = vcmp.ge.f32.partialorder %v1509_v7, 0.0  ;;  %v1620_v17 = vmul.f32 0.1, %v1508_v61 }
 0x130   : > { %v1623_v16 = vmul.f32 0.1, %v1511_v10  ;;  %v1673_v18 = vsel %vm1561_vm7, %v1505_v50, %v1617_v2  ;;  %v2193_v19 = vrot.slane %v2415_v53, 7  ;;  %v1672_v22 = vsel %vm1560_vm6, %v1504_v9, %v1616_v60  ;;  %vm2936_vm1 = vmand %vm2261_vm11, %vm2262_vm12 }
 0x131   : > { %v1674_v47 = vsel %vm1562_vm8, %v1506_v57, %v1618_v11  ;;  %v1675_v1 = vsel %vm1563_vm9, %v1507_v44, %v1619_v3  ;;  %vm1566_vm15 = vcmp.ge.f32.partialorder %v1510_v54, 0.0  ;;  %vm1567_vm0 = vcmp.ge.f32.partialorder %v1511_v10, 0.0 }
 0x132   : > { %v1622_v37 = vmul.f32 0.1, %v1510_v54  ;;  %v1905_v32 = vcombine.low %v1671_v6, %v1672_v22  ;;  %v2194_v33 = vrot.slane %v2193_v19, 4  ;;  %2226 = vst.msk [vmem:[%s2721_s26] sm:$0xe] %vm2225_vm4, %v2193_v19  ;;  %v2897_v35 = vsel %vm1565_vm13, %v1509_v7, %v1621_v13 }
 0x133   : > { %v1906_v23 = vcombine.low %v1673_v18, %v1674_v47  ;;  %v1934_v21 = vrot.slane %v1675_v1, %v2524_v12  ;;  %v2901_v27 = vsel %vm1564_vm10, %v1508_v61, %v1620_v17  ;;  %v1913_v29 = vrot.slane %v1904_v62, %v2524_v12  ;;  %v2242_v1 = vld [vmem:[%s2721_s26 + $0x1c] sm:$0x1] }
 0x134   : > { %v1920_v38 = vrot.slane %v1905_v32, %v2524_v12  ;;  %v1069_v26 = vcombine.high %v2761_v55, %v2761_v55  ;;  %v2231_v42 = vsel %vm2889_vm14, %v2194_v33, %v2230_v14  ;;  %v2909_v43 = vsel %vm1567_vm0, %v1511_v10, %v1623_v16 }
 0x135   : > { %v1927_v46 = vrot.slane %v1906_v23, %v2524_v12  ;;  %v1076_v34 = vrot.slane %v2761_v55, %v2524_v12  ;;  %2232 = vst [vmem:[%s2721_s26 + $0x4] sm:$0x1] %v2231_v42  ;;  %v2916_v9 = vsel %vm1566_vm15, %v1510_v54, %v1622_v37  ;;  %v1952_v56 = vcombine.low %v2901_v27, %v2897_v35 }
 0x136   : > { %v1935_v50 = vcombine.low %v1913_v29, %v1920_v38  ;;  %v1083_v48 = vrot.slane %v1069_v26, %v2524_v12  ;;  %vm1543_vm3 = vcmp.ge.f32.partialorder %v2852_v28, 0.0  ;;  %v1953_v55 = vcombine.low %v2916_v9, %v2909_v43 }
 0x137   : > { %v1936_v57 = vcombine.low %v1927_v46, %v1934_v21  ;;  %v1084_v61 = vcombine.high %v1076_v34, %v1076_v34  ;;  %v1092_v62 = vrot.slane %v1076_v34, %v2524_v12  ;;  %v1655_v11 = vsel %vm1543_vm3, %v2852_v28, %v2874_v58 }
 0x138   : > { %v1943_v63 = vrot.slane %v1935_v50, %v2524_v12  ;;  %v1085_v41 = vcombine.high %v1083_v48, %v1083_v48  ;;  %v1099_v44 = vrot.slane %v1083_v48, %v2524_v12  ;;  %v1008_v21 = vadd.f32 %v2797_v15, %v2817_v52 }
 0x139   : > { %v1950_v8 = vrot.slane %v1936_v57, %v2524_v12  ;;  %v1106_v7 = vrot.slane %v1084_v61, %v2524_v12  ;;  %v1114_v10 = vcombine.high %v1092_v62, %v1092_v62  ;;  %v1488_v30 = vadd.f32 %v2748_v39, %v1092_v62 }
 0x13a   : > { %v1113_v54 = vrot.slane %v1085_v41, %v2524_v12  ;;  %v1115_v60 = vcombine.high %v1099_v44, %v1099_v44  ;;  %v1492_v2 = vadd.f32 %v2770_v59, %v1099_v44 }
 0x13b   : > { %v1951_v3 = vcombine.low %v1943_v63, %v1950_v8  ;;  %v1116_v13 = vcombine.high %v1106_v7, %v1106_v7  ;;  %v1489_v6 = vadd.f32 %v2758_v51, %v1106_v7  ;;  %v1490_v17 = vadd.f32 %v2767_v31, %v1114_v10 }
 0x13c   : > { %v1117_v16 = vcombine.high %v1113_v54, %v1113_v54  ;;  %v1493_v18 = vadd.f32 %v2774_v40, %v1113_v54  ;;  %v1494_v19 = vadd.f32 %v2745_v25, %v1115_v60  ;;  %vm1544_vm2 = vcmp.ge.f32.partialorder %v1488_v30, 0.0  ;;  %v2264_v28 = vld [vmem:[%s2721_s26 + $0x4] sm:$0x3] }
 0x13d   : > { %v2418_v58 = vpack.c.bf16 %v1951_v3, %v1951_v3  ;;  %v1491_v22 = vadd.f32 %v2751_v20, %v1116_v13  ;;  %vm1545_vm5 = vcmp.ge.f32.partialorder %v1489_v6, 0.0  ;;  %vm1546_vm6 = vcmp.ge.f32.partialorder %v1490_v17, 0.0 }
 0x13e   : > { %v2265_v47 = vsel %vm2936_vm1, 0, %v2264_v28  ;;  %v1495_v14 = vadd.f32 %v2748_v39, %v1117_v16  ;;  %vm1548_vm7 = vcmp.ge.f32.partialorder %v1492_v2, 0.0  ;;  %vm1549_vm8 = vcmp.ge.f32.partialorder %v1493_v18, 0.0 }
 0x13f   : > { %2266 = vst [vmem:[%s2721_s26 + $0x4] sm:$0x3] %v2265_v47  ;;  %v2199_v37 = vrot.slane %v2418_v58, 7  ;;  %vm1547_vm9 = vcmp.ge.f32.partialorder %v1491_v22, 0.0  ;;  %vm1550_vm10 = vcmp.ge.f32.partialorder %v1494_v19, 0.0  ;;  %v1314_v60 = vcombine.high %v1008_v21, %v1008_v21 }
 0x140   : > { %v1600_v32 = vmul.f32 0.1, %v1488_v30  ;;  %vm1551_vm11 = vcmp.ge.f32.partialorder %v1495_v14, 0.0  ;;  %v1601_v33 = vmul.f32 0.1, %v1489_v6  ;;  %v1321_v3 = vrot.slane %v1008_v21, %v2524_v12 }
 0x141   : > { %v1602_v23 = vmul.f32 0.1, %v1490_v17  ;;  %v2200_v29 = vrot.slane %v2199_v37, 4  ;;  %2241 = vst.msk [vmem:[%s2721_s26 + $0x18] sm:$0xe] %vm2225_vm4, %v2199_v37  ;;  %v1902_v16 = vrot.slane %v2871_v5, %v2524_v12 }
 0x142   : > { %v1603_v38 = vmul.f32 0.1, %v1491_v22  ;;  %v1604_v26 = vmul.f32 0.1, %v1492_v2  ;;  %v1656_v42 = vsel %vm1544_vm2, %v1488_v30, %v1600_v32  ;;  %v1605_v46 = vmul.f32 0.1, %v1493_v18 }
 0x143   : > { %v1606_v34 = vmul.f32 0.1, %v1494_v19  ;;  %v1607_v50 = vmul.f32 0.1, %v1495_v14  ;;  %v1657_v48 = vsel %vm1545_vm5, %v1489_v6, %v1601_v33  ;;  %v2243_v57 = vsel %vm2889_vm14, %v2200_v29, %v2242_v1 }
 0x144   : > { %v1658_v61 = vsel %vm1546_vm6, %v1490_v17, %v1602_v23  ;;  %v1659_v62 = vsel %vm1547_vm9, %v1491_v22, %v1603_v38  ;;  %v1660_v15 = vsel %vm1548_vm7, %v1492_v2, %v1604_v26  ;;  %2244 = vst [vmem:[%s2721_s26 + $0x1c] sm:$0x1] %v2243_v57  ;;  %v1661_v52 = vsel %vm1549_vm8, %v1493_v18, %v1605_v46 }
 0x145   : > { %v1662_v63 = vsel %vm1550_vm10, %v1494_v19, %v1606_v34  ;;  %v1663_v41 = vsel %vm1551_vm11, %v1495_v14, %v1607_v50  ;;  %v1808_v44 = vcombine.low %v1655_v11, %v1656_v42  ;;  %v1809_v8 = vcombine.low %v1657_v48, %v1658_v61  ;;  %v2234_v48 = vld [vmem:[%s2721_s26 + $0xc] sm:$0x1] }
 0x146   : > { %v1810_v7 = vcombine.low %v1659_v62, %v1660_v15  ;;  %v1838_v10 = vrot.slane %v1661_v52, %v2524_v12  ;;  %v1856_v30 = vcombine.low %v1662_v63, %v1663_v41  ;;  %v2971_v2 = vadd.f32 %v2801_v36, %v2825_v49  ;;  %v2238_v52 = vld [vmem:[%s2721_s26 + $0x14] sm:$0x1] }
 0x147   : > { %v1817_v54 = vrot.slane %v1808_v44, %v2524_v12  ;;  %v1824_v13 = vrot.slane %v1809_v8, %v2524_v12  ;;  %v2978_v17 = vadd.f32 %v2812_v45, %v2836_v4  ;;  %v1328_v18 = vrot.slane %v1314_v60, %v2524_v12 }
 0x148   : > { %v1831_v6 = vrot.slane %v1810_v7, %v2524_v12  ;;  %v1865_v11 = vrot.slane %v1856_v30, %v2524_v12  ;;  %v1329_v19 = vcombine.high %v1321_v3, %v1321_v3  ;;  %v1337_v36 = vrot.slane %v1321_v3, %v2524_v12 }
 0x149   : > { %v2988_v49 = vrot.slane %v1952_v56, %v2524_v12  ;;  %v1839_v28 = vcombine.low %v1817_v54, %v1824_v13  ;;  %v1330_v4 = vcombine.high %v1328_v18, %v1328_v18  ;;  %v1344_v22 = vrot.slane %v1328_v18, %v2524_v12 }
 0x14a   : > { %v1840_v58 = vcombine.low %v1831_v6, %v1838_v10  ;;  %v1887_v45 = vcombine.low %v1865_v11, %v2833_v0  ;;  %v1351_v5 = vrot.slane %v1329_v19, %v2524_v12  ;;  %v1359_v47 = vcombine.high %v1337_v36, %v1337_v36 }
 0x14b   : > { %v2997_v1 = vrot.slane %v1953_v55, %v2524_v12  ;;  %v2273_v35 = vld [vmem:[%s2721_s26 + $0x1c] sm:$0x3]  ;;  %v1847_v27 = vrot.slane %v1839_v28, %v2524_v12  ;;  %v1358_v37 = vrot.slane %v1330_v4, %v2524_v12  ;;  %v1360_v32 = vcombine.high %v1344_v22, %v1344_v22 }
 0x14c   : > { %v1854_v56 = vrot.slane %v1840_v58, %v2524_v12  ;;  %v1895_v14 = vrot.slane %v1887_v45, %v2524_v12  ;;  %v2274_v0 = vsel %vm2936_vm1, 0, %v2273_v35  ;;  %v1361_v33 = vcombine.high %v1351_v5, %v1351_v5 }
 0x14d   : > { %2275 = vst [vmem:[%s2721_s26 + $0x1c] sm:$0x3] %v2274_v0  ;;  %v1529_v9 = vadd.f32 %v2745_v25, %v1351_v5  ;;  %v1530_v55 = vadd.f32 %v2748_v39, %v1359_v47  ;;  %v1362_v21 = vcombine.high %v1358_v37, %v1358_v37  ;;  %v1532_v38 = vadd.f32 %v2767_v31, %v1344_v22 }
 0x14e   : > { %v1855_v23 = vcombine.low %v1847_v27, %v1854_v56  ;;  %v1903_v43 = vcombine.low %v1895_v14, %v1902_v16  ;;  %v1531_v29 = vadd.f32 %v2758_v51, %v1361_v33  ;;  %v1533_v26 = vadd.f32 %v2751_v20, %v1358_v37 }
 0x14f   : > { %v1534_v34 = vadd.f32 %v2770_v59, %v1360_v32  ;;  %v1216_v50 = vcombine.high %v2971_v2, %v2971_v2  ;;  %v1535_v57 = vadd.f32 %v2774_v40, %v1362_v21  ;;  %vm1585_vm12 = vcmp.ge.f32.partialorder %v1529_v9, 0.0 }
 0x150   : > { %v2416_v42 = vpack.c.bf16 %v1855_v23, %v1855_v23  ;;  %v2417_v46 = vpack.c.bf16 %v1903_v43, %v1903_v43  ;;  %vm1586_vm13 = vcmp.ge.f32.partialorder %v1530_v55, 0.0  ;;  %v1223_v61 = vrot.slane %v2971_v2, %v2524_v12 }
 0x151   : > { %vm1587_vm15 = vcmp.ge.f32.partialorder %v1531_v29, 0.0  ;;  %vm1588_vm0 = vcmp.ge.f32.partialorder %v1532_v38, 0.0  ;;  %vm1589_vm3 = vcmp.ge.f32.partialorder %v1533_v26, 0.0  ;;  %vm1590_vm2 = vcmp.ge.f32.partialorder %v1534_v34, 0.0 }
 0x152   : > { %v2195_v62 = vrot.slane %v2416_v42, 7  ;;  %v2197_v15 = vrot.slane %v2417_v46, 7  ;;  %vm1591_vm5 = vcmp.ge.f32.partialorder %v1535_v57, 0.0  ;;  %v1641_v63 = vmul.f32 0.1, %v1529_v9 }
 0x153   : > { %v1642_v8 = vmul.f32 0.1, %v1530_v55  ;;  %v1643_v7 = vmul.f32 0.1, %v1531_v29  ;;  %v3025_v10 = vadd.f32 %v2774_v40, %v1337_v36  ;;  %v1644_v30 = vmul.f32 0.1, %v1532_v38 }
 0x154   : > { %v2196_v41 = vrot.slane %v2195_v62, 4  ;;  %v2198_v44 = vrot.slane %v2197_v15, 4  ;;  %2233 = vst.msk [vmem:[%s2721_s26 + $0x8] sm:$0xe] %vm2225_vm4, %v2195_v62  ;;  %2237 = vst.msk [vmem:[%s2721_s26 + $0x10] sm:$0xe] %vm2225_vm4, %v2197_v15  ;;  %v1697_v6 = vsel %vm1585_vm12, %v1529_v9, %v1641_v63  ;;  %v1983_v11 = vcombine.low %v2988_v49, %v2997_v1 }
 0x155   : > { %v1645_v54 = vmul.f32 0.1, %v1533_v26  ;;  %v1646_v60 = vmul.f32 0.1, %v1534_v34  ;;  %v1647_v13 = vmul.f32 0.1, %v1535_v57  ;;  %v1698_v16 = vsel %vm1586_vm13, %v1530_v55, %v1642_v8 }
 0x156   : > { %v2235_v3 = vsel %vm2889_vm14, %v2196_v41, %v2234_v48  ;;  %v2239_v2 = vsel %vm2889_vm14, %v2198_v44, %v2238_v52  ;;  %v1699_v18 = vsel %vm1587_vm15, %v1531_v29, %v1643_v7  ;;  %v1700_v36 = vsel %vm1588_vm0, %v1532_v38, %v1644_v30 }
 0x157   : > { %2236 = vst [vmem:[%s2721_s26 + $0xc] sm:$0x1] %v2235_v3  ;;  %2240 = vst [vmem:[%s2721_s26 + $0x14] sm:$0x1] %v2239_v2  ;;  %v1701_v19 = vsel %vm1589_vm3, %v1533_v26, %v1645_v54  ;;  %v1702_v28 = vsel %vm1590_vm2, %v1534_v34, %v1646_v60  ;;  %v1703_v58 = vsel %vm1591_vm5, %v1535_v57, %v1647_v13  ;;  %v1640_v35 = vmul.f32 0.1, %v3025_v10 }
 0x158   : > { %v2096_v45 = vcombine.low %v1697_v6, %v1698_v16  ;;  %v2097_v4 = vcombine.low %v1699_v18, %v1700_v36  ;;  %v2098_v22 = vcombine.low %v1701_v19, %v1702_v28  ;;  %v2126_v5 = vrot.slane %v1703_v58, %v2524_v12 }
 0x159   : > { %v1230_v47 = vrot.slane %v1216_v50, %v2524_v12  ;;  %v1231_v56 = vcombine.high %v1223_v61, %v1223_v61  ;;  %v1239_v14 = vrot.slane %v1223_v61, %v2524_v12  ;;  %vm1584_vm6 = vcmp.ge.f32.partialorder %v3025_v10, 0.0 }
 0x15a   : > { %v2105_v27 = vrot.slane %v2096_v45, %v2524_v12  ;;  %v2112_v0 = vrot.slane %v2097_v4, %v2524_v12  ;;  %v2119_v37 = vrot.slane %v2098_v22, %v2524_v12  ;;  %v1265_v55 = vcombine.high %v2978_v17, %v2978_v17  ;;  %v2258_v4 = vld [vmem:[%s2721_s26 + $0x3c] sm:$0x1] }
 0x15b   : > { %v1232_v32 = vcombine.high %v1230_v47, %v1230_v47  ;;  %v1246_v33 = vrot.slane %v1230_v47, %v2524_v12  ;;  %v1253_v23 = vrot.slane %v1231_v56, %v2524_v12  ;;  %v1261_v43 = vcombine.high %v1239_v14, %v1239_v14 }
 0x15c   : > { %v1512_v9 = vadd.f32 %v2751_v20, %v1239_v14  ;;  %v2127_v21 = vcombine.low %v2105_v27, %v2112_v0  ;;  %v2128_v29 = vcombine.low %v2119_v37, %v2126_v5  ;;  %v1272_v16 = vrot.slane %v2978_v17, %v2524_v12 }
 0x15d   : > { %v1260_v38 = vrot.slane %v1232_v32, %v2524_v12  ;;  %v1262_v26 = vcombine.high %v1246_v33, %v1246_v33  ;;  %v1263_v34 = vcombine.high %v1253_v23, %v1253_v23  ;;  %v1513_v50 = vadd.f32 %v2770_v59, %v1253_v23 }
 0x15e   : > { %v2267_v42 = vld [vmem:[%s2721_s26 + $0xc] sm:$0x3]  ;;  %v2270_v46 = vld [vmem:[%s2721_s26 + $0x14] sm:$0x3]  ;;  %v1514_v48 = vadd.f32 %v2774_v40, %v1261_v43  ;;  %v1516_v57 = vadd.f32 %v2748_v39, %v1246_v33  ;;  %v2135_v15 = vrot.slane %v2127_v21, %v2524_v12  ;;  %v2142_v52 = vrot.slane %v2128_v29, %v2524_v12 }
 0x15f   : > { %v2268_v61 = vsel %vm2936_vm1, 0, %v2267_v42  ;;  %v2271_v62 = vsel %vm2936_vm1, 0, %v2270_v46  ;;  %v1264_v63 = vcombine.high %v1260_v38, %v1260_v38  ;;  %v1515_v41 = vadd.f32 %v2745_v25, %v1263_v34 }
 0x160   : > { %2269 = vst [vmem:[%s2721_s26 + $0xc] sm:$0x3] %v2268_v61  ;;  %2272 = vst [vmem:[%s2721_s26 + $0x14] sm:$0x3] %v2271_v62  ;;  %v1517_v44 = vadd.f32 %v2758_v51, %v1260_v38  ;;  %v1518_v8 = vadd.f32 %v2767_v31, %v1262_v26  ;;  %v2143_v7 = vcombine.low %v2135_v15, %v2142_v52  ;;  %vm1568_vm7 = vcmp.ge.f32.partialorder %v1512_v9, 0.0 }
 0x161   : > { %vm1569_vm8 = vcmp.ge.f32.partialorder %v1513_v50, 0.0  ;;  %vm1570_vm9 = vcmp.ge.f32.partialorder %v1514_v48, 0.0  ;;  %v3073_v30 = vadd.f32 %v2751_v20, %v1264_v63  ;;  %vm1571_vm10 = vcmp.ge.f32.partialorder %v1515_v41, 0.0 }
 0x162   : > { %vm1572_vm11 = vcmp.ge.f32.partialorder %v1516_v57, 0.0  ;;  %vm1573_vm12 = vcmp.ge.f32.partialorder %v1517_v44, 0.0  ;;  %v2422_v54 = vpack.c.bf16 %v2143_v7, %v2143_v7  ;;  %vm1574_vm13 = vcmp.ge.f32.partialorder %v1518_v8, 0.0 }
 0x163   : > { %v1624_v60 = vmul.f32 0.1, %v1512_v9  ;;  %v1625_v3 = vmul.f32 0.1, %v1513_v50  ;;  %v1626_v2 = vmul.f32 0.1, %v1514_v48  ;;  %v1279_v28 = vrot.slane %v1265_v55, %v2524_v12 }
 0x164   : > { %v1627_v13 = vmul.f32 0.1, %v1515_v41  ;;  %v1628_v6 = vmul.f32 0.1, %v1516_v57  ;;  %v2207_v18 = vrot.slane %v2422_v54, 7  ;;  %v1991_v58 = vrot.slane %v1983_v11, %v2524_v12 }
 0x165   : > { %v1629_v19 = vmul.f32 0.1, %v1517_v44  ;;  %v1630_v36 = vmul.f32 0.1, %v1518_v8  ;;  %v3085_v45 = vsel %vm1584_vm6, %v3025_v10, %v1640_v35  ;;  %v1680_v22 = vsel %vm1568_vm7, %v1512_v9, %v1624_v60 }
 0x166   : > { %v1681_v17 = vsel %vm1569_vm8, %v1513_v50, %v1625_v3  ;;  %v2208_v5 = vrot.slane %v2207_v18, 4  ;;  %2257 = vst.msk [vmem:[%s2721_s26 + $0x38] sm:$0xe] %vm2225_vm4, %v2207_v18  ;;  %v1631_v47 = vmul.f32 0.1, %v3073_v30  ;;  %v1682_v27 = vsel %vm1570_vm9, %v1514_v48, %v1626_v2 }
 0x167   : > { %v1683_v49 = vsel %vm1571_vm10, %v1515_v41, %v1627_v13  ;;  %v1684_v1 = vsel %vm1572_vm11, %v1516_v57, %v1628_v6  ;;  %v1685_v10 = vsel %vm1573_vm12, %v1517_v44, %v1629_v19  ;;  %v1686_v11 = vsel %vm1574_vm13, %v1518_v8, %v1630_v36  ;;  %v2246_v13 = vld [vmem:[%s2721_s26 + $0x24] sm:$0x1] }
 0x168   : > { %v1954_v35 = vcombine.low %v1680_v22, %v1681_v17  ;;  %v2259_v56 = vsel %vm2889_vm14, %v2208_v5, %v2258_v4  ;;  %v1280_v14 = vcombine.high %v1272_v16, %v1272_v16  ;;  %v1281_v0 = vcombine.high %v1279_v28, %v1279_v28 }
 0x169   : > { %v1288_v37 = vrot.slane %v1272_v16, %v2524_v12  ;;  %2260 = vst [vmem:[%s2721_s26 + $0x3c] sm:$0x1] %v2259_v56  ;;  %v1982_v33 = vrot.slane %v1682_v27, %v2524_v12  ;;  %v2000_v23 = vcombine.low %v1683_v49, %v1684_v1  ;;  %v1295_v43 = vrot.slane %v1279_v28, %v2524_v12 }
 0x16a   : > { %v1975_v32 = vrot.slane %v1954_v35, %v2524_v12  ;;  %v1302_v9 = vrot.slane %v1280_v14, %v2524_v12  ;;  %v1309_v55 = vrot.slane %v1281_v0, %v2524_v12  ;;  %v2001_v26 = vcombine.low %v1685_v10, %v1686_v11 }
 0x16b   : > { %v1310_v21 = vcombine.high %v1288_v37, %v1288_v37  ;;  %v1520_v29 = vadd.f32 %v2770_v59, %v1288_v37  ;;  %v1311_v42 = vcombine.high %v1295_v43, %v1295_v43  ;;  %v1524_v46 = vadd.f32 %v2758_v51, %v1295_v43 }
 0x16c   : > { %v1984_v38 = vcombine.low %v1975_v32, %v1982_v33  ;;  %v1312_v34 = vcombine.high %v1302_v9, %v1302_v9  ;;  %v1313_v50 = vcombine.high %v1309_v55, %v1309_v55  ;;  %v1521_v48 = vadd.f32 %v2774_v40, %v1302_v9 }
 0x16d   : > { %v1522_v57 = vadd.f32 %v2745_v25, %v1310_v21  ;;  %v2009_v62 = vrot.slane %v2000_v23, %v2524_v12  ;;  %v1525_v15 = vadd.f32 %v2767_v31, %v1309_v55  ;;  %v1526_v52 = vadd.f32 %v2751_v20, %v1311_v42 }
 0x16e   : > { %v1998_v61 = vrot.slane %v1984_v38, %v2524_v12  ;;  %v1523_v63 = vadd.f32 %v2748_v39, %v1312_v34  ;;  %v1527_v41 = vadd.f32 %v2770_v59, %v1313_v50  ;;  %vm1575_vm15 = vcmp.ge.f32.partialorder %v3073_v30, 0.0  ;;  %v2250_v50 = vld [vmem:[%s2721_s26 + $0x2c] sm:$0x1] }
 0x16f   : > { %vm1576_vm0 = vcmp.ge.f32.partialorder %v1520_v29, 0.0  ;;  %vm1577_vm3 = vcmp.ge.f32.partialorder %v1521_v48, 0.0  ;;  %vm1578_vm2 = vcmp.ge.f32.partialorder %v1522_v57, 0.0  ;;  %vm1580_vm5 = vcmp.ge.f32.partialorder %v1524_v46, 0.0 }
 0x170   : > { %v1999_v51 = vcombine.low %v1991_v58, %v1998_v61  ;;  %v2285_v25 = vld [vmem:[%s2721_s26 + $0x3c] sm:$0x3]  ;;  %vm1579_vm6 = vcmp.ge.f32.partialorder %v1523_v63, 0.0  ;;  %vm1581_vm7 = vcmp.ge.f32.partialorder %v1525_v15, 0.0  ;;  %vm1582_vm8 = vcmp.ge.f32.partialorder %v1526_v52, 0.0 }
 0x171   : > { %vm1583_vm9 = vcmp.ge.f32.partialorder %v1527_v41, 0.0  ;;  %v2286_v20 = vsel %vm2936_vm1, 0, %v2285_v25  ;;  %v1632_v31 = vmul.f32 0.1, %v1520_v29  ;;  %v1633_v59 = vmul.f32 0.1, %v1521_v48 }
 0x172   : > { %v2419_v39 = vpack.c.bf16 %v1999_v51, %v1999_v51  ;;  %2287 = vst [vmem:[%s2721_s26 + $0x3c] sm:$0x3] %v2286_v20  ;;  %v2016_v40 = vrot.slane %v2001_v26, %v2524_v12  ;;  %v1634_v44 = vmul.f32 0.1, %v1522_v57  ;;  %v1635_v8 = vmul.f32 0.1, %v1523_v63 }
 0x173   : > { %v1636_v7 = vmul.f32 0.1, %v1524_v46  ;;  %v1637_v60 = vmul.f32 0.1, %v1525_v15  ;;  %v1638_v3 = vmul.f32 0.1, %v1526_v52  ;;  %v1687_v2 = vsel %vm1575_vm15, %v3073_v30, %v1631_v47 }
 0x174   : > { %v2201_v54 = vrot.slane %v2419_v39, 7  ;;  %v1639_v6 = vmul.f32 0.1, %v1527_v41  ;;  %v1688_v16 = vsel %vm1576_vm0, %v1520_v29, %v1632_v31  ;;  %v1689_v18 = vsel %vm1577_vm3, %v1521_v48, %v1633_v59 }
 0x175   : > { %v1691_v19 = vsel %vm1579_vm6, %v1523_v63, %v1635_v8  ;;  %v1690_v28 = vsel %vm1578_vm2, %v1522_v57, %v1634_v44  ;;  %v1692_v58 = vsel %vm1580_vm5, %v1524_v46, %v1636_v7  ;;  %v1693_v4 = vsel %vm1581_vm7, %v1525_v15, %v1637_v60 }
 0x176   : > { %v2202_v36 = vrot.slane %v2201_v54, 4  ;;  %2245 = vst.msk [vmem:[%s2721_s26 + $0x20] sm:$0xe] %vm2225_vm4, %v2201_v54  ;;  %v1694_v30 = vsel %vm1582_vm8, %v1526_v52, %v1638_v3  ;;  %v1695_v22 = vsel %vm1583_vm9, %v1527_v41, %v1639_v6  ;;  %v2002_v17 = vcombine.low %v1687_v2, %v1688_v16 }
 0x177   : > { %v2048_v5 = vcombine.low %v1690_v28, %v1691_v19  ;;  %v2049_v27 = vcombine.low %v1692_v58, %v1693_v4  ;;  %v2050_v49 = vcombine.low %v1694_v30, %v1695_v22  ;;  %v2031_v1 = vcombine.low %v2009_v62, %v2016_v40 }
 0x178   : > { %v2247_v47 = vsel %vm2889_vm14, %v2202_v36, %v2246_v13  ;;  %v2023_v10 = vrot.slane %v2002_v17, %v2524_v12  ;;  %v2030_v11 = vrot.slane %v1689_v18, %v2524_v12  ;;  %v2078_v56 = vrot.slane %v3085_v45, %v2524_v12 }
 0x179   : > { %2248 = vst [vmem:[%s2721_s26 + $0x24] sm:$0x1] %v2247_v47  ;;  %v2057_v35 = vrot.slane %v2048_v5, %v2524_v12  ;;  %v2064_v14 = vrot.slane %v2049_v27, %v2524_v12  ;;  %v2071_v0 = vrot.slane %v2050_v49, %v2524_v12  ;;  %v2039_v23 = vrot.slane %v2031_v1, %v2524_v12 }
 0x17a   : > { %v2032_v37 = vcombine.low %v2023_v10, %v2030_v11 }
 0x17b   : > { %v2079_v32 = vcombine.low %v2057_v35, %v2064_v14  ;;  %v2080_v33 = vcombine.low %v2071_v0, %v2078_v56 }
 0x17c   : > { %v2046_v43 = vrot.slane %v2032_v37, %v2524_v12 }
 0x17d   : > { %v2087_v9 = vrot.slane %v2079_v32, %v2524_v12  ;;  %v2094_v55 = vrot.slane %v2080_v33, %v2524_v12  ;;  %v2254_v12 = vld [vmem:[%s2721_s26 + $0x34] sm:$0x1] }
 0x17e   : > { %v2047_v45 = vcombine.low %v2039_v23, %v2046_v43 }
 0x17f   : > { %v2095_v29 = vcombine.low %v2087_v9, %v2094_v55 }
 0x180   : > { %v2276_v21 = vld [vmem:[%s2721_s26 + $0x24] sm:$0x3]  ;;  %v2420_v26 = vpack.c.bf16 %v2047_v45, %v2047_v45 }
 0x181   : > { %v2277_v38 = vsel %vm2936_vm1, 0, %v2276_v21  ;;  %v2421_v42 = vpack.c.bf16 %v2095_v29, %v2095_v29 }
 0x182   : > { %2278 = vst [vmem:[%s2721_s26 + $0x24] sm:$0x3] %v2277_v38  ;;  %v2203_v46 = vrot.slane %v2420_v26, 7 }
 0x183   : > { %v2205_v34 = vrot.slane %v2421_v42, 7 }
 0x184   : > { %v2204_v48 = vrot.slane %v2203_v46, 4  ;;  %2249 = vst.msk [vmem:[%s2721_s26 + $0x28] sm:$0xe] %vm2225_vm4, %v2203_v46 }
 0x185   : > { %v2206_v57 = vrot.slane %v2205_v34, 4  ;;  %2253 = vst.msk [vmem:[%s2721_s26 + $0x30] sm:$0xe] %vm2225_vm4, %v2205_v34 }
 0x186   : > { %v2251_v61 = vsel %vm2889_vm14, %v2204_v48, %v2250_v50 }
 0x187   : > { %2252 = vst [vmem:[%s2721_s26 + $0x2c] sm:$0x1] %v2251_v61  ;;  %v2255_v62 = vsel %vm2889_vm14, %v2206_v57, %v2254_v12 }
 0x188   : > { %2256 = vst [vmem:[%s2721_s26 + $0x34] sm:$0x1] %v2255_v62 }
 0x18e   : > { %v2279_v15 = vld [vmem:[%s2721_s26 + $0x2c] sm:$0x3] }
 0x18f   : > { %v2280_v52 = vsel %vm2936_vm1, 0, %v2279_v15  ;;  %v2282_v63 = vld [vmem:[%s2721_s26 + $0x34] sm:$0x3] }
 0x190   : > { %2281 = vst [vmem:[%s2721_s26 + $0x2c] sm:$0x3] %v2280_v52  ;;  %v2283_v41 = vsel %vm2936_vm1, 0, %v2282_v63 }
 0x191   : > { %2284 = vst [vmem:[%s2721_s26 + $0x34] sm:$0x3] %v2283_v41 }
 0x192 PF: > { %s13_s12 = sadd.s32 1, %s2477_s12  }
 0x193   : > { %p10_p4 = scmp.ge.s32.totalorder %s13_s12, 4  }
 0x195   :  { %12 = sbr.rel (!%p10_p4) target bundleno = 1 (0x1), region = 63 }

</bundles_post_ra>
